<compile_context>
chip_gen: v7x
topology: tpu7x:2x2x1
jax: 0.10.0
libtpu: 0.0.40
codegen_flags: <defaults>
</compile_context>

<pallas_src>
import jax
import jax.numpy as jnp
from jax import lax
from jax.experimental import pallas as pl
from jax.experimental.pallas import tpu as pltpu


def _convlstm_kernel(x_ref, h_ref, c_ref, wx_ref, wh_ref, b_ref,
                     hn_ref, cn_ref):
    # x_ref : (TB, T + K - 1, F)   time-padded input slab
    # h_ref : (TB, T + K - 1, H)   time-padded hidden state
    # c_ref : (TB, T, H)
    # wx_ref: (K, F, 4H), wh_ref: (K, H, 4H), b_ref: (1, 4H)
    TB, Tp, F = x_ref.shape
    K = wx_ref.shape[0]
    H = wh_ref.shape[1]
    O = wx_ref.shape[2]          # 4H
    T = Tp - (K - 1)
    M = TB * T                   # MXU row count per grid step

    gates = jnp.zeros((M, O), dtype=jnp.float32)
    # K is small & static: unrolled shifted matmuls implement the same-padded
    # cross-correlation Conv1d over the time axis (exactly PyTorch semantics).
    for k in range(K):
        xk = x_ref[:, k:k + T, :].reshape(M, F)
        hk = h_ref[:, k:k + T, :].reshape(M, H)
        gates = gates + jnp.dot(xk, wx_ref[k],
                                preferred_element_type=jnp.float32)
        gates = gates + jnp.dot(hk, wh_ref[k],
                                preferred_element_type=jnp.float32)
    gates = gates + b_ref[...].astype(jnp.float32)      # (1, 4H) broadcast

    i_t = jax.nn.sigmoid(gates[:, 0 * H:1 * H])
    f_t = jax.nn.sigmoid(gates[:, 1 * H:2 * H])
    o_t = jax.nn.sigmoid(gates[:, 2 * H:3 * H])
    g_t = jnp.tanh(gates[:, 3 * H:4 * H])

    c_curr = c_ref[...].reshape(M, H).astype(jnp.float32)
    c_next = f_t * c_curr + i_t * g_t
    h_next = o_t * jnp.tanh(c_next)

    cn_ref[...] = c_next.reshape(TB, T, H).astype(cn_ref.dtype)
    hn_ref[...] = h_next.reshape(TB, T, H).astype(hn_ref.dtype)


def convlstm_cell(x, h_curr, c_curr, w_conv, b_conv, *, block_b=None):
    """
    x      : (B, T, F)        input_tensor (batch_first)
    h_curr : (B, T, H)
    c_curr : (B, T, H)
    w_conv : (4H, F+H, K)     PyTorch Conv1d weight (out_ch, in_ch, kernel)
    b_conv : (4H,)
    returns (h_next, c_next)  each (B, T, H)
    """
    B, T, F = x.shape
    H = h_curr.shape[2]
    O, Cin, K = w_conv.shape
    assert O == 4 * H and Cin == F + H

    # "Same"-padding convention (matches torch padding='same'):
    # left = (K-1)//2, right = K-1-left.
    pad_l = (K - 1) // 2
    pad_r = (K - 1) - pad_l
    x_p = jnp.pad(x, ((0, 0), (pad_l, pad_r), (0, 0)))
    h_p = jnp.pad(h_curr, ((0, 0), (pad_l, pad_r), (0, 0)))
    Tp = T + K - 1

    # Pre-transpose conv weight once (outside the kernel) to (K, Cin, 4H) and
    # split into x / h parts, folding away the channel concat.
    w_t = jnp.transpose(w_conv, (2, 1, 0))        # (K, Cin, 4H)
    wx = w_t[:, :F, :]                            # (K, F, 4H)
    wh = w_t[:, F:, :]                            # (K, H, 4H)
    bias = b_conv.reshape(1, 4 * H)

    if block_b is None:
        divisors = [d for d in range(1, B + 1) if B % d == 0]
        target = max(1, 256 // T)                 # ~256 MXU rows per step
        block_b = max(d for d in divisors if d <= target)
        # v7x megacore: prefer >=2 grid steps if a >=128-row tile still allows.
        if B // block_b < 2:
            cands = [d for d in divisors if B // d >= 2 and d * T >= 128]
            if cands:
                block_b = max(cands)
    assert B % block_b == 0
    grid = (B // block_b,)

    flops = 2 * B * T * K * (F + H) * (4 * H)
    transcendentals = 5 * B * T * H               # 3 sigmoid + 2 tanh per elem
    bytes_accessed = 4 * (x.size + h_curr.size + c_curr.size
                          + w_conv.size + b_conv.size + 2 * B * T * H)

    h_next, c_next = pl.pallas_call(
        _convlstm_kernel,
        out_shape=(jax.ShapeDtypeStruct((B, T, H), x.dtype),
                   jax.ShapeDtypeStruct((B, T, H), x.dtype)),
        grid_spec=pltpu.PrefetchScalarGridSpec(
            num_scalar_prefetch=0,
            grid=grid,
            in_specs=[
                pl.BlockSpec((block_b, Tp, F), lambda i: (i, 0, 0)),
                pl.BlockSpec((block_b, Tp, H), lambda i: (i, 0, 0)),
                pl.BlockSpec((block_b, T, H), lambda i: (i, 0, 0)),
                pl.BlockSpec((K, F, 4 * H), lambda i: (0, 0, 0)),
                pl.BlockSpec((K, H, 4 * H), lambda i: (0, 0, 0)),
                pl.BlockSpec((1, 4 * H), lambda i: (0, 0)),
            ],
            out_specs=[
                pl.BlockSpec((block_b, T, H), lambda i: (i, 0, 0)),
                pl.BlockSpec((block_b, T, H), lambda i: (i, 0, 0)),
            ],
        ),
        compiler_params=pltpu.CompilerParams(
            dimension_semantics=("parallel",)),
        cost_estimate=pl.CostEstimate(
            flops=int(flops),
            transcendentals=int(transcendentals),
            bytes_accessed=int(bytes_accessed)),
    )(x_p, h_p, c_curr, wx, wh, bias)
    return h_next, c_next


def convlstm_cell_ref(x, h_curr, c_curr, w_conv, b_conv):
    """Pure-JAX reference mirroring PyTorch ConvLSTMCell.forward."""
    K = w_conv.shape[2]
    pad_l = (K - 1) // 2
    pad_r = (K - 1) - pad_l

    combine = jnp.concatenate([x, h_curr], axis=2)           # (B, T, F+H)
    y = lax.conv_general_dilated(
        combine, w_conv,
        window_strides=(1,),
        padding=[(pad_l, pad_r)],
        dimension_numbers=("NWC", "OIW", "NWC"))             # (B, T, 4H)
    y = y + b_conv
    i_g, f_g, o_g, g_g = jnp.split(y, 4, axis=2)
    i_t = jax.nn.sigmoid(i_g)
    f_t = jax.nn.sigmoid(f_g)
    o_t = jax.nn.sigmoid(o_g)
    g_t = jnp.tanh(g_g)
    c_next = f_t * c_curr + i_t * g_t
    h_next = o_t * jnp.tanh(c_next)
    return h_next, c_next


if __name__ == "__main__":
    # ConvLSTMCell(input_shape=(T, F), hidden_size=H, kernel_size=K)
    B, T, F, H, K = 2, 8, 16, 32, 3

    key = jax.random.PRNGKey(0)
    kx, kh, kc, kw, kb = jax.random.split(key, 5)

    x = jax.random.normal(kx, (B, T, F), dtype=jnp.float32)
    h0 = jax.random.normal(kh, (B, T, H), dtype=jnp.float32)
    c0 = jax.random.normal(kc, (B, T, H), dtype=jnp.float32)

    cin = F + H
    bound = 1.0 / jnp.sqrt(cin * K)           # nn.Conv1d default init bound
    w_conv = jax.random.uniform(kw, (4 * H, cin, K), dtype=jnp.float32,
                                minval=-bound, maxval=bound)
    b_conv = jax.random.uniform(kb, (4 * H,), dtype=jnp.float32,
                                minval=-bound, maxval=bound)

    h_next, c_next = convlstm_cell(x, h0, c0, w_conv, b_conv)
    h_next = jax.block_until_ready(h_next)
    c_next = jax.block_until_ready(c_next)

    h_ref, c_ref = convlstm_cell_ref(x, h0, c0, w_conv, b_conv)
    assert h_next.shape == (B, T, H) and c_next.shape == (B, T, H)
    assert jnp.allclose(h_next, h_ref, atol=2e-4, rtol=2e-4), "h_next mismatch"
    assert jnp.allclose(c_next, c_ref, atol=2e-4, rtol=2e-4), "c_next mismatch"

    print("KERNEL_OK")
</pallas_src>

<mosaic_0001>
module attributes {stable_mosaic.version = 11 : i64} {
  func.func @_convlstm_kernel(%arg0: i32, %arg1: memref<2x10x16xf32, #tpu.memory_space<vmem>>, %arg2: memref<2x10x32xf32, #tpu.memory_space<vmem>>, %arg3: memref<2x8x32xf32, #tpu.memory_space<vmem>>, %arg4: memref<3x16x128xf32, #tpu.memory_space<vmem>>, %arg5: memref<3x32x128xf32, #tpu.memory_space<vmem>>, %arg6: memref<1x128xf32, #tpu.memory_space<vmem>>, %arg7: memref<2x8x32xf32, #tpu.memory_space<vmem>>, %arg8: memref<2x8x32xf32, #tpu.memory_space<vmem>>) attributes {dimension_semantics = [#tpu.dimension_semantics<parallel>], iteration_bounds = array<i64: 1>, scalar_prefetch = 0 : i64, scratch_operands = 0 : i64, tpu.core_type = #tpu.core_type<tc>, window_params = [{transform_indices = @transform_0, window_bounds = array<i64: 2, 10, 16>}, {transform_indices = @transform_1, window_bounds = array<i64: 2, 10, 32>}, {transform_indices = @transform_2, window_bounds = array<i64: 2, 8, 32>}, {pipeline_mode = #tpu.pipeline_mode<synchronous>, transform_indices = @transform_3, window_bounds = array<i64: 3, 16, 128>}, {pipeline_mode = #tpu.pipeline_mode<synchronous>, transform_indices = @transform_4, window_bounds = array<i64: 3, 32, 128>}, {pipeline_mode = #tpu.pipeline_mode<synchronous>, transform_indices = @transform_5, window_bounds = array<i64: 1, 128>}, {transform_indices = @transform_6, window_bounds = array<i64: 2, 8, 32>}, {transform_indices = @transform_7, window_bounds = array<i64: 2, 8, 32>}]} {
    %cst = arith.constant 0.000000e+00 : f32
    %0 = vector.broadcast %cst : f32 to vector<16x128xf32>
    %c0 = arith.constant 0 : index
    %c0_0 = arith.constant 0 : index
    %c0_1 = arith.constant 0 : index
    %1 = vector.load %arg1[%c0, %c0_0, %c0_1] : memref<2x10x16xf32, #tpu.memory_space<vmem>>, vector<2x8x16xf32>
    %2 = vector.shape_cast %1 : vector<2x8x16xf32> to vector<16x16xf32>
    %c0_2 = arith.constant 0 : index
    %c0_3 = arith.constant 0 : index
    %c0_4 = arith.constant 0 : index
    %3 = vector.load %arg2[%c0_2, %c0_3, %c0_4] : memref<2x10x32xf32, #tpu.memory_space<vmem>>, vector<2x8x32xf32>
    %4 = vector.shape_cast %3 : vector<2x8x32xf32> to vector<16x32xf32>
    %c0_5 = arith.constant 0 : index
    %c0_6 = arith.constant 0 : index
    %c0_7 = arith.constant 0 : index
    %5 = vector.load %arg4[%c0_5, %c0_6, %c0_7] : memref<3x16x128xf32, #tpu.memory_space<vmem>>, vector<1x16x128xf32>
    %6 = vector.shape_cast %5 : vector<1x16x128xf32> to vector<16x128xf32>
    %cst_8 = arith.constant dense<0.000000e+00> : vector<16x128xf32>
    %7 = tpu.matmul %2, %6, %cst_8 {dimension_numbers = #tpu.dot_dimension_numbers<[1], [0], [0], [1], [0, 0, 1, 1], [], []>} : vector<16x16xf32>, vector<16x128xf32>, vector<16x128xf32> -> vector<16x128xf32>
    %8 = arith.addf %0, %7 : vector<16x128xf32>
    %c0_9 = arith.constant 0 : index
    %c0_10 = arith.constant 0 : index
    %c0_11 = arith.constant 0 : index
    %9 = vector.load %arg5[%c0_9, %c0_10, %c0_11] : memref<3x32x128xf32, #tpu.memory_space<vmem>>, vector<1x32x128xf32>
    %10 = vector.shape_cast %9 : vector<1x32x128xf32> to vector<32x128xf32>
    %cst_12 = arith.constant dense<0.000000e+00> : vector<16x128xf32>
    %11 = tpu.matmul %4, %10, %cst_12 {dimension_numbers = #tpu.dot_dimension_numbers<[1], [0], [0], [1], [0, 0, 1, 1], [], []>} : vector<16x32xf32>, vector<32x128xf32>, vector<16x128xf32> -> vector<16x128xf32>
    %12 = arith.addf %8, %11 : vector<16x128xf32>
    %c0_13 = arith.constant 0 : index
    %c1 = arith.constant 1 : index
    %c0_14 = arith.constant 0 : index
    %13 = vector.load %arg1[%c0_13, %c1, %c0_14] : memref<2x10x16xf32, #tpu.memory_space<vmem>>, vector<2x8x16xf32>
    %14 = vector.shape_cast %13 : vector<2x8x16xf32> to vector<16x16xf32>
    %c0_15 = arith.constant 0 : index
    %c1_16 = arith.constant 1 : index
    %c0_17 = arith.constant 0 : index
    %15 = vector.load %arg2[%c0_15, %c1_16, %c0_17] : memref<2x10x32xf32, #tpu.memory_space<vmem>>, vector<2x8x32xf32>
    %16 = vector.shape_cast %15 : vector<2x8x32xf32> to vector<16x32xf32>
    %c1_18 = arith.constant 1 : index
    %c0_19 = arith.constant 0 : index
    %c0_20 = arith.constant 0 : index
    %17 = vector.load %arg4[%c1_18, %c0_19, %c0_20] : memref<3x16x128xf32, #tpu.memory_space<vmem>>, vector<1x16x128xf32>
    %18 = vector.shape_cast %17 : vector<1x16x128xf32> to vector<16x128xf32>
    %cst_21 = arith.constant dense<0.000000e+00> : vector<16x128xf32>
    %19 = tpu.matmul %14, %18, %cst_21 {dimension_numbers = #tpu.dot_dimension_numbers<[1], [0], [0], [1], [0, 0, 1, 1], [], []>} : vector<16x16xf32>, vector<16x128xf32>, vector<16x128xf32> -> vector<16x128xf32>
    %20 = arith.addf %12, %19 : vector<16x128xf32>
    %c1_22 = arith.constant 1 : index
    %c0_23 = arith.constant 0 : index
    %c0_24 = arith.constant 0 : index
    %21 = vector.load %arg5[%c1_22, %c0_23, %c0_24] : memref<3x32x128xf32, #tpu.memory_space<vmem>>, vector<1x32x128xf32>
    %22 = vector.shape_cast %21 : vector<1x32x128xf32> to vector<32x128xf32>
    %cst_25 = arith.constant dense<0.000000e+00> : vector<16x128xf32>
    %23 = tpu.matmul %16, %22, %cst_25 {dimension_numbers = #tpu.dot_dimension_numbers<[1], [0], [0], [1], [0, 0, 1, 1], [], []>} : vector<16x32xf32>, vector<32x128xf32>, vector<16x128xf32> -> vector<16x128xf32>
    %24 = arith.addf %20, %23 : vector<16x128xf32>
    %c0_26 = arith.constant 0 : index
    %c2 = arith.constant 2 : index
    %c0_27 = arith.constant 0 : index
    %25 = vector.load %arg1[%c0_26, %c2, %c0_27] : memref<2x10x16xf32, #tpu.memory_space<vmem>>, vector<2x8x16xf32>
    %26 = vector.shape_cast %25 : vector<2x8x16xf32> to vector<16x16xf32>
    %c0_28 = arith.constant 0 : index
    %c2_29 = arith.constant 2 : index
    %c0_30 = arith.constant 0 : index
    %27 = vector.load %arg2[%c0_28, %c2_29, %c0_30] : memref<2x10x32xf32, #tpu.memory_space<vmem>>, vector<2x8x32xf32>
    %28 = vector.shape_cast %27 : vector<2x8x32xf32> to vector<16x32xf32>
    %c2_31 = arith.constant 2 : index
    %c0_32 = arith.constant 0 : index
    %c0_33 = arith.constant 0 : index
    %29 = vector.load %arg4[%c2_31, %c0_32, %c0_33] : memref<3x16x128xf32, #tpu.memory_space<vmem>>, vector<1x16x128xf32>
    %30 = vector.shape_cast %29 : vector<1x16x128xf32> to vector<16x128xf32>
    %cst_34 = arith.constant dense<0.000000e+00> : vector<16x128xf32>
    %31 = tpu.matmul %26, %30, %cst_34 {dimension_numbers = #tpu.dot_dimension_numbers<[1], [0], [0], [1], [0, 0, 1, 1], [], []>} : vector<16x16xf32>, vector<16x128xf32>, vector<16x128xf32> -> vector<16x128xf32>
    %32 = arith.addf %24, %31 : vector<16x128xf32>
    %c2_35 = arith.constant 2 : index
    %c0_36 = arith.constant 0 : index
    %c0_37 = arith.constant 0 : index
    %33 = vector.load %arg5[%c2_35, %c0_36, %c0_37] : memref<3x32x128xf32, #tpu.memory_space<vmem>>, vector<1x32x128xf32>
    %34 = vector.shape_cast %33 : vector<1x32x128xf32> to vector<32x128xf32>
    %cst_38 = arith.constant dense<0.000000e+00> : vector<16x128xf32>
    %35 = tpu.matmul %28, %34, %cst_38 {dimension_numbers = #tpu.dot_dimension_numbers<[1], [0], [0], [1], [0, 0, 1, 1], [], []>} : vector<16x32xf32>, vector<32x128xf32>, vector<16x128xf32> -> vector<16x128xf32>
    %36 = arith.addf %32, %35 : vector<16x128xf32>
    %c0_39 = arith.constant 0 : index
    %c0_40 = arith.constant 0 : index
    %37 = vector.load %arg6[%c0_39, %c0_40] : memref<1x128xf32, #tpu.memory_space<vmem>>, vector<1x128xf32>
    %38 = vector.broadcast %37 : vector<1x128xf32> to vector<16x128xf32>
    %39 = arith.addf %36, %38 : vector<16x128xf32>
    %40 = vector.extract_strided_slice %39 {offsets = [0, 0], sizes = [16, 32], strides = [1, 1]} : vector<16x128xf32> to vector<16x32xf32>
    %41 = arith.negf %40 : vector<16x32xf32>
    %42 = math.exp %41 : vector<16x32xf32>
    %cst_41 = arith.constant 1.000000e+00 : f32
    %43 = vector.broadcast %cst_41 : f32 to vector<16x32xf32>
    %44 = arith.addf %43, %42 : vector<16x32xf32>
    %45 = arith.divf %43, %44 : vector<16x32xf32>
    %46 = vector.extract_strided_slice %39 {offsets = [0, 32], sizes = [16, 32], strides = [1, 1]} : vector<16x128xf32> to vector<16x32xf32>
    %47 = arith.negf %46 : vector<16x32xf32>
    %48 = math.exp %47 : vector<16x32xf32>
    %cst_42 = arith.constant 1.000000e+00 : f32
    %49 = vector.broadcast %cst_42 : f32 to vector<16x32xf32>
    %50 = arith.addf %49, %48 : vector<16x32xf32>
    %51 = arith.divf %49, %50 : vector<16x32xf32>
    %52 = vector.extract_strided_slice %39 {offsets = [0, 64], sizes = [16, 32], strides = [1, 1]} : vector<16x128xf32> to vector<16x32xf32>
    %53 = arith.negf %52 : vector<16x32xf32>
    %54 = math.exp %53 : vector<16x32xf32>
    %cst_43 = arith.constant 1.000000e+00 : f32
    %55 = vector.broadcast %cst_43 : f32 to vector<16x32xf32>
    %56 = arith.addf %55, %54 : vector<16x32xf32>
    %57 = arith.divf %55, %56 : vector<16x32xf32>
    %58 = vector.extract_strided_slice %39 {offsets = [0, 96], sizes = [16, 32], strides = [1, 1]} : vector<16x128xf32> to vector<16x32xf32>
    %59 = math.tanh %58 : vector<16x32xf32>
    %c0_44 = arith.constant 0 : index
    %c0_45 = arith.constant 0 : index
    %c0_46 = arith.constant 0 : index
    %60 = vector.load %arg3[%c0_44, %c0_45, %c0_46] : memref<2x8x32xf32, #tpu.memory_space<vmem>>, vector<2x8x32xf32>
    %61 = vector.shape_cast %60 : vector<2x8x32xf32> to vector<16x32xf32>
    %62 = arith.mulf %51, %61 : vector<16x32xf32>
    %63 = arith.mulf %45, %59 : vector<16x32xf32>
    %64 = arith.addf %62, %63 : vector<16x32xf32>
    %65 = math.tanh %64 : vector<16x32xf32>
    %66 = arith.mulf %57, %65 : vector<16x32xf32>
    %67 = vector.shape_cast %64 : vector<16x32xf32> to vector<2x8x32xf32>
    %c0_47 = arith.constant 0 : index
    %c0_48 = arith.constant 0 : index
    %c0_49 = arith.constant 0 : index
    %68 = vector.load %arg8[%c0_47, %c0_48, %c0_49] : memref<2x8x32xf32, #tpu.memory_space<vmem>>, vector<2x8x32xf32>
    tpu.vector_store %arg8[%c0_47, %c0_48, %c0_49], %67 {strides = array<i32>} : memref<2x8x32xf32, #tpu.memory_space<vmem>>, vector<2x8x32xf32>,
    %69 = vector.shape_cast %66 : vector<16x32xf32> to vector<2x8x32xf32>
    %c0_50 = arith.constant 0 : index
    %c0_51 = arith.constant 0 : index
    %c0_52 = arith.constant 0 : index
    %70 = vector.load %arg7[%c0_50, %c0_51, %c0_52] : memref<2x8x32xf32, #tpu.memory_space<vmem>>, vector<2x8x32xf32>
    tpu.vector_store %arg7[%c0_50, %c0_51, %c0_52], %69 {strides = array<i32>} : memref<2x8x32xf32, #tpu.memory_space<vmem>>, vector<2x8x32xf32>,
    return
  }
  func.func @transform_0(%arg0: i32) -> (i32, i32, i32) {
    %c0_i32 = arith.constant 0 : i32
    %c0_i32_0 = arith.constant 0 : i32
    %c0_i32_1 = arith.constant 0 : i32
    return %arg0, %c0_i32, %c0_i32_0 : i32, i32, i32
  }
  func.func @transform_1(%arg0: i32) -> (i32, i32, i32) {
    %c0_i32 = arith.constant 0 : i32
    %c0_i32_0 = arith.constant 0 : i32
    %c0_i32_1 = arith.constant 0 : i32
    return %arg0, %c0_i32, %c0_i32_0 : i32, i32, i32
  }
  func.func @transform_2(%arg0: i32) -> (i32, i32, i32) {
    %c0_i32 = arith.constant 0 : i32
    %c0_i32_0 = arith.constant 0 : i32
    %c0_i32_1 = arith.constant 0 : i32
    return %arg0, %c0_i32, %c0_i32_0 : i32, i32, i32
  }
  func.func @transform_3(%arg0: i32) -> (i32, i32, i32) {
    %c0_i32 = arith.constant 0 : i32
    %c0_i32_0 = arith.constant 0 : i32
    %c0_i32_1 = arith.constant 0 : i32
    %c0_i32_2 = arith.constant 0 : i32
    return %c0_i32, %c0_i32_0, %c0_i32_1 : i32, i32, i32
  }
  func.func @transform_4(%arg0: i32) -> (i32, i32, i32) {
    %c0_i32 = arith.constant 0 : i32
    %c0_i32_0 = arith.constant 0 : i32
    %c0_i32_1 = arith.constant 0 : i32
    %c0_i32_2 = arith.constant 0 : i32
    return %c0_i32, %c0_i32_0, %c0_i32_1 : i32, i32, i32
  }
  func.func @transform_5(%arg0: i32) -> (i32, i32) {
    %c0_i32 = arith.constant 0 : i32
    %c0_i32_0 = arith.constant 0 : i32
    %c0_i32_1 = arith.constant 0 : i32
    return %c0_i32, %c0_i32_0 : i32, i32
  }
  func.func @transform_6(%arg0: i32) -> (i32, i32, i32) {
    %c0_i32 = arith.constant 0 : i32
    %c0_i32_0 = arith.constant 0 : i32
    %c0_i32_1 = arith.constant 0 : i32
    return %arg0, %c0_i32, %c0_i32_0 : i32, i32, i32
  }
  func.func @transform_7(%arg0: i32) -> (i32, i32, i32) {
    %c0_i32 = arith.constant 0 : i32
    %c0_i32_0 = arith.constant 0 : i32
    %c0_i32_1 = arith.constant 0 : i32
    return %arg0, %c0_i32, %c0_i32_0 : i32, i32, i32
  }
}

</mosaic_0001>

<bundles_post_ra>
// kernel: tpu_custom_call.1
= control target key start
LH: loop header
LB: loop body
LE: loop exit
PB: predicated region body
PF: predicated region fallthrough
CT: control target
= control target key end

     0   :  { %13 = vsyncpa [#allocation3], 0  ;;  %s1138_s0 = inlined_call_operand.vmem [shape: f32[2,10,16], index: 0, kind: input, shape index: {}]   ;;  %s1139_s1 = inlined_call_operand.vmem [shape: f32[2,10,32], index: 1, kind: input, shape index: {}]   ;;  %s1140_s2 = inlined_call_operand.vmem [shape: f32[2,8,32], index: 2, kind: input, shape index: {}]   ;;  %s1141_s3 = inlined_call_operand.hbm [shape: f32[3,16,128], index: 3, kind: input, shape index: {}]   ;;  %s1142_s4 = inlined_call_operand.vmem [shape: f32[3,32,128], index: 4, kind: input, shape index: {}]   ;;  %s1143_s5 = inlined_call_operand.vmem [shape: f32[1,128], index: 5, kind: input, shape index: {}]   ;;  %s1144_s6 = inlined_call_operand.hbm [shape: f32[2,8,32], index: 6, kind: output, shape index: {0}]   ;;  %s1145_s7 = inlined_call_operand.hbm [shape: f32[2,8,32], index: 7, kind: output, shape index: {1}]  }
   0x1   :  { %14 = vsyncpa [#allocation4], 0 }
   0x2   :  { %15 = vsyncpa [#allocation7], 0  ;;  %s940_s24 = smov [#allocation2]   ;;  %s868_s28 = scalar_lea.hbm %s1141_s3, 768 }
   0x3   :  { %s27_s25 = sshll.u32 %s940_s24, 4  ;;  %p869_p0 = scmp.ne.s32.totalorder %s1141_s3, %s868_s28  ;;  %s28_s25 = int_to_ptr.vmem [resolvable:$true] %s27_s25 }
   0x4   :  { %p872_p1 = scmp.lt.u32.totalorder %s868_s28, %s1141_s3 }
   0x6   :  { %p874_p2 = pnand %p872_p1, %p869_p0 }
   0x8   :  { %877 = shalt.err (!%p874_p2)
}
   0x9   :  { %s878_s10 = scalar_lea.vmem %s28_s25, 768  ;;  %p883_p4 = scmp.lt.s32.totalorder %s28_s25, %s28_s25 }
   0xa   :  { %p879_p3 = scmp.ne.s32.totalorder %s28_s25, %s878_s10  ;;  %p884_p5 = scmp.lt.s32.totalorder %s878_s10, %s878_s10 }
   0xc   :  { %p885_p6 = por %p884_p5, %p883_p4 }
   0xe   :  { %p886_p7 = pnand %p885_p6, %p879_p3 }
  0x10   :  { %889 = shalt.err (!%p886_p7)
}
  0x11   :  { %s941_s11 = smov 128   ;;  %s942_s12 = smov 8  }
  0x12   :  { %33 = dma.hbm_to_vmem [thread:$0]  %s1141_s3, 768, %s28_s25, [#allocation3], %s941_s11, %s941_s11, %s942_s12  }
  0x13   :  { %934 = dma.done.wait [#allocation3], 768  }
  0x14   :  { %935 = vsyncadd [#allocation3], 4294966528  ;;  %vm133_vm0 = vcmask 130048   ;;  %v47_v0 = vld [vmem:[%s1142_s4] sm:$0xff]  ;;  %v48_v1 = vld [vmem:[%s1142_s4 + $0x8] sm:$0xff]  ;;  %vm51_vm1 = vcmask 261120  }
  0x15   :  { %v45_v2 = vld [vmem:[#allocation2] sm:$0xff]  ;;  %v798_v3 = vpack.c.bf16 %v48_v1, %v47_v0  ;;  %v46_v4 = vld [vmem:[#allocation2 + $0x8] sm:$0xff]  ;;  %v49_v6 = vld [vmem:[%s1142_s4 + $0x10] sm:$0xff]  ;;  %s943_s26 = smov 32   ;;  %s946_s22 = smov [#allocation6]  }
  0x16   :  { %v41_v5 = vld [vmem:[%s1138_s0] sm:$0xff]  ;;  %v806_v7 = vpack.c.bf16 %v46_v4, %v45_v2  ;;  %v50_v8 = vld [vmem:[%s1142_s4 + $0x18] sm:$0xff]  ;;  %v220_v9 = vld [vmem:[#allocation2 + $0x10] sm:$0xff]  ;;  %s675_s23 = sshll.u32 %s946_s22, 4  ;;  %s676_s23 = int_to_ptr.vmem [resolvable:$true] %s675_s23 }
  0x17   :  { %759 = vmatprep.mubr.msk.f32.mxu0 %vm133_vm0, %v41_v5  ;;  %799 = vmatprep.subr.bf16.mxu1 %v798_v3  ;;  %v802_v10 = vpack.c.bf16 %v50_v8, %v49_v6  ;;  %v221_v11 = vld [vmem:[#allocation2 + $0x18] sm:$0xff]  ;;  %v43_v12 = vld [vmem:[%s1139_s1] sm:$0xff]  ;;  %v698_v15 = vld [vmem:[%s1142_s4 + $0x28] sm:$0xff]  ;;  %s890_s24 = scalar_lea.vmem %s676_s23, 256  ;;  %p895_p9 = scmp.lt.s32.totalorder %s676_s23, %s676_s23 }
  0x18   :  { %v697_v13 = vld [vmem:[%s1142_s4 + $0x20] sm:$0xff]  ;;  %807 = vmatprep.subr.bf16.mxu0 %v806_v7  ;;  %801 = vmatpush3.bf16.msra.mxu1 %v798_v3  ;;  %v810_v14 = vpack.c.bf16 %v221_v11, %v220_v9  ;;  %v42_v16 = vld [vmem:[%s1138_s0 + $0x10] sm:$0xff]  ;;  %v700_v19 = vld [vmem:[%s1142_s4 + $0x38] sm:$0xff]  ;;  %p891_p8 = scmp.ne.s32.totalorder %s676_s23, %s890_s24  ;;  %p896_p10 = scmp.lt.s32.totalorder %s890_s24, %s890_s24 }
  0x19   :  { %809 = vmatpush3.bf16.msra.mxu0 %v806_v7  ;;  %803 = vmatprep.subr.bf16.mxu1 %v802_v10  ;;  %v814_v17 = vpack.c.bf16 %v698_v15, %v697_v13  ;;  %v699_v18 = vld [vmem:[%s1142_s4 + $0x30] sm:$0xff]  ;;  %v398_v20 = vld [vmem:[#allocation2 + $0x20] sm:$0xff]  ;;  %v399_v21 = vld [vmem:[#allocation2 + $0x28] sm:$0xff] }
  0x1a   :  { %811 = vmatprep.subr.bf16.mxu0 %v810_v14  ;;  %752 = vmatprep.mubr.msk.f32.mxu1 %vm51_vm1, %v43_v12  ;;  %v215_v22 = vld [vmem:[%s1138_s0 + $0x1] sm:$0xff]  ;;  %v822_v23 = vpack.c.bf16 %v399_v21, %v398_v20  ;;  %v44_v24 = vld [vmem:[%s1139_s1 + $0x10] sm:$0xff]  ;;  %v818_v25 = vpack.c.bf16 %v700_v19, %v699_v18  ;;  %v708_v35 = vld [vmem:[%s1142_s4 + $0x58] sm:$0xff]  ;;  %p897_p11 = por %p896_p10, %p895_p9 }
  0x1b   :  { %v217_v26 = vld [vmem:[%s1139_s1 + $0x1] sm:$0xff]  ;;  %v216_v31 = vld [vmem:[%s1138_s0 + $0x11] sm:$0xff]  ;;  %v711_v53 = vld [vmem:[%s1143_s5] ss:$0 sm:$0xff]  ;;  %s945_s5 = smov 64  }
  0x1c   :  { %760 = vmatmul.mubr.msk.f32.vlgmr.msra.gmra.mrb[0].mxu0 %vm133_vm0, %v42_v16  ;;  %805 = vmatpush3.bf16.msra.mxu1 %v802_v10  ;;  %v594_v27 = vld [vmem:[%s1140_s2] sm:$0xff]  ;;  %v706_v29 = vld [vmem:[%s1142_s4 + $0x48] sm:$0xff]  ;;  %v707_v34 = vld [vmem:[%s1142_s4 + $0x50] sm:$0xff]  ;;  %p898_p12 = pnand %p897_p11, %p891_p8 }
  0x1d   :  { %813 = vmatpush3.bf16.msra.mxu0 %v810_v14  ;;  %815 = vmatprep.subr.bf16.mxu1 %v814_v17  ;;  %v705_v28 = vld [vmem:[%s1142_s4 + $0x40] sm:$0xff]  ;;  %v595_v30 = vld [vmem:[%s1140_s2 + $0x8] sm:$0xff]  ;;  %v218_v36 = vld [vmem:[%s1139_s1 + $0x11] sm:$0xff]  ;;  %v830_v38 = vpack.c.bf16 %v708_v35, %v707_v34 }
  0x1e   :  { %766 = vmatprep.mubr.msk.f32.mxu0 %vm133_vm0, %v215_v22  ;;  %823 = vmatprep.subr.bf16.mxu0 %v822_v23  ;;  %v393_v32 = vld [vmem:[%s1138_s0 + $0x2] sm:$0xff]  ;;  %v826_v33 = vpack.c.bf16 %v706_v29, %v705_v28  ;;  %v394_v37 = vld [vmem:[%s1138_s0 + $0x12] sm:$0xff] }
  0x1f   :  { %753 = vmatmul.mubr.msk.f32.vlgmr.msra.gmra.mrb[0].mxu1 %vm51_vm1, %v44_v24  ;;  %598 = vrot.lane.b32.xlu1 %v594_v27, %s943_s26  ;;  %v395_v39 = vld [vmem:[%s1139_s1 + $0x2] sm:$0xff]  ;;  %v396_v40 = vld [vmem:[%s1139_s1 + $0x12] sm:$0xff]  ;;  %s944_s1 = smov 96  }
  0x20   :  { %817 = vmatpush3.bf16.msra.mxu1 %v814_v17  ;;  %777 = vmatprep.mubr.msk.f32.mxu1 %vm51_vm1, %v217_v26 }
  0x21   :  { %819 = vmatprep.subr.bf16.mxu1 %v818_v25 }
  0x23   :  { %600 = vrot.lane.b32.xlu1 %v595_v30, %s943_s26 }
  0x24   :  { %767 = vmatmul.mubr.msk.f32.vlgmr.msra.gmra.mrb[0].mxu0 %vm133_vm0, %v216_v31  ;;  %821 = vmatpush3.bf16.msra.mxu1 %v818_v25 }
  0x25   :  { %825 = vmatpush3.bf16.msra.mxu0 %v822_v23  ;;  %784 = vmatprep.mubr.msk.f32.mxu0 %vm133_vm0, %v393_v32 }
  0x26   :  { %827 = vmatprep.subr.bf16.mxu0 %v826_v33 }
  0x27   :  { %778 = vmatmul.mubr.msk.f32.vlgmr.msra.gmra.mrb[2].mxu1 %vm51_vm1, %v218_v36 }
  0x28   :  { %785 = vmatmul.mubr.msk.f32.vlgmr.msra.gmra.mrb[2].mxu0 %vm133_vm0, %v394_v37 }
  0x29   :  { %829 = vmatpush3.bf16.msra.mxu0 %v826_v33  ;;  %795 = vmatprep.mubr.msk.f32.mxu0 %vm51_vm1, %v395_v39 }
  0x2a   :  { %831 = vmatprep.subr.bf16.mxu0 %v830_v38 }
  0x2d   :  { %833 = vmatpush3.bf16.msra.mxu0 %v830_v38 }
  0x30   :  { %796 = vmatmul.mubr.msk.f32.vlgmr.msra.gmra.mrb[2].mxu0 %vm51_vm1, %v396_v40 }
  0x91   :  { %v599_v8 = vpop.permute.xlu1 %598 }
  0x95   :  { %v601_v10 = vpop.permute.xlu1 %600 }
  0xf2   :  { %v754_v41 = vpop.f32.mrb[0].mxu1 }
  0xf3   :  { %v124_v42 = vpop.f32.mrb[1].mxu1 }
  0xf7   :  { %v768_v43 = vpop.f32.mrb[0].mxu0 }
  0xf8   :  { %v834_v44 = vadd.f32 %v768_v43, %v754_v41  ;;  %v294_v45 = vpop.f32.mrb[1].mxu0 }
  0xf9   :  { %v837_v46 = vadd.f32 %v294_v45, %v124_v42 }
  0xfa   :  { %v779_v47 = vpop.f32.mrb[2].mxu1 }
  0xfb   :  { %v835_v48 = vadd.f32 %v834_v44, %v779_v47  ;;  %v382_v49 = vpop.f32.mrb[3].mxu1 }
  0xfc   :  { %v838_v50 = vadd.f32 %v837_v46, %v382_v49 }
 0x103   :  { %v797_v51 = vpop.f32.mrb[2].mxu0 }
 0x104   :  { %v836_v52 = vadd.f32 %v835_v48, %v797_v51  ;;  %v560_v54 = vpop.f32.mrb[3].mxu0 }
 0x105   :  { %v839_v55 = vadd.f32 %v838_v50, %v560_v54 }
 0x106   :  { %v579_v57 = vadd.f32 %v836_v52, %v711_v53 }
 0x107   :  { %v578_v56 = vadd.f32 %v839_v55, %v711_v53 }
 0x108   :  { %v713_v61 = vmul.f32 -1.442695, %v579_v57 }
 0x109   :  { %852 = vtanh.f32 %v578_v56  ;;  %v712_v60 = vmul.f32 -1.442695, %v578_v56 }
 0x10a   :  { %854 = vtanh.f32 %v579_v57 }
 0x10b   :  { %856 = vpow2.f32 %v712_v60 }
 0x10c   :  { %858 = vpow2.f32 %v713_v61 }
 0x113   :  { %v853_v58 = vpop.eup %852 }
 0x114   :  { %608 = vrot.lane.b32.xlu0 %v853_v58, %s943_s26  ;;  %v855_v59 = vpop.eup %854 }
 0x115   :  { %v857_v62 = vpop.eup %856 }
 0x116   :  { %v586_v63 = vadd.f32 1.0, %v857_v62  ;;  %v859_v0 = vpop.eup %858 }
 0x117   :  { %v587_v1 = vadd.f32 1.0, %v859_v0 }
 0x118   :  { %610 = vrot.lane.b32.xlu0 %v855_v59, %s943_s26  ;;  %860 = vrcp.f32 %v586_v63 }
 0x119   :  { %862 = vrcp.f32 %v587_v1 }
 0x122   :  { %v861_v2 = vpop.eup %860 }
 0x123   :  { %v863_v5 = vpop.eup %862  ;;  %v604_v9 = vmul.f32 %v861_v2, %v599_v8 }
 0x124   :  { %v605_v13 = vmul.f32 %v863_v5, %v601_v10 }
 0x186   :  { %v609_v3 = vpop.permute.xlu0 %608 }
 0x187   :  { %v614_v4 = vmul.f32 %v861_v2, %v609_v3 }
 0x189   :  { %618 = vrot.lane.b32.xlu0 %v614_v4, %s943_s26 }
 0x18a   :  { %v611_v6 = vpop.permute.xlu0 %610 }
 0x18b   :  { %v615_v7 = vmul.f32 %v863_v5, %v611_v6 }
 0x18d   :  { %620 = vrot.lane.b32.xlu1 %v615_v7, %s943_s26 }
 0x1fb   :  { %v619_v11 = vpop.permute.xlu0 %618 }
 0x1fc   :  { %v624_v12 = vadd.f32 %v619_v11, %v604_v9 }
 0x1fe   :  { %864 = vtanh.f32 %v624_v12 }
 0x1ff   :  { %v621_v14 = vpop.permute.xlu1 %620 }
 0x200   :  { %v625_v15 = vadd.f32 %v621_v14, %v605_v13 }
 0x202   :  { %866 = vtanh.f32 %v625_v15 }
 0x208   :  { %v865_v16 = vpop.eup %864 }
 0x209   :  { %630 = vrot.lane.b32.xlu0 %v865_v16, %s943_s26 }
 0x20c   :  { %v867_v17 = vpop.eup %866 }
 0x20d   :  { %632 = vrot.lane.b32.xlu1 %v867_v17, %s943_s26  ;;  %640 = vrot.lane.b32.xlu0 %v624_v12, %s944_s1 }
 0x211   :  { %642 = vrot.lane.b32.xlu1 %v625_v15, %s944_s1 }
 0x27b   :  { %v631_v18 = vpop.permute.xlu0 %630 }
 0x27c   :  { %v636_v19 = vmul.f32 %v861_v2, %v631_v18 }
 0x27e   :  { %650 = vrot.lane.b32.xlu0 %v636_v19, %s945_s5 }
 0x27f   :  { %v633_v20 = vpop.permute.xlu1 %632  ;;  %v641_v21 = vpop.permute.xlu0 %640 }
 0x280   :  { %v637_v22 = vmul.f32 %v863_v5, %v633_v20  ;;  %646 = vst.msk [vmem:[#allocation6] sm:$0xff] %vm51_vm1, %v641_v21 }
 0x282   :  { %652 = vrot.lane.b32.xlu1 %v637_v22, %s945_s5 }
 0x283   :  { %v643_v23 = vpop.permute.xlu1 %642 }
 0x284   :  { %647 = vst.msk [vmem:[#allocation6 + $0x8] sm:$0xff] %vm51_vm1, %v643_v23 }
 0x285   :  { %901 = shalt.err (!%p898_p12)
}
 0x286   :  { %s902_s27 = scalar_lea.hbm %s1145_s7, 256 }
 0x287   :  { %p903_p13 = scmp.ne.s32.totalorder %s1145_s7, %s902_s27  ;;  %p906_p0 = scmp.lt.u32.totalorder %s902_s27, %s1145_s7 }
 0x289   :  { %p908_p1 = pnand %p906_p0, %p903_p13 }
 0x28b   :  { %911 = shalt.err (!%p908_p1)
}
 0x28c   :  { %681 = dma.vmem_to_hbm [thread:$0]  %s676_s23, 256, %s1145_s7, [#allocation7], %s941_s11, %s941_s11, %s942_s12  }
 0x28d   :  { %s947_s13 = smov [#allocation5]  }
 0x28e   :  { %s663_s14 = sshll.u32 %s947_s13, 4  ;;  %s664_s14 = int_to_ptr.vmem [resolvable:$true] %s663_s14 }
 0x28f   :  { %s912_s15 = scalar_lea.vmem %s664_s14, 256  ;;  %p917_p3 = scmp.lt.s32.totalorder %s664_s14, %s664_s14 }
 0x290   :  { %p913_p2 = scmp.ne.s32.totalorder %s664_s14, %s912_s15  ;;  %p918_p4 = scmp.lt.s32.totalorder %s912_s15, %s912_s15 }
 0x292   :  { %p919_p5 = por %p918_p4, %p917_p3 }
 0x294   :  { %p920_p6 = pnand %p919_p5, %p913_p2 }
 0x2f0   :  { %v651_v24 = vpop.permute.xlu0 %650 }
 0x2f1   :  { %656 = vst.msk [vmem:[#allocation5] sm:$0xff] %vm51_vm1, %v651_v24 }
 0x2f4   :  { %v653_v25 = vpop.permute.xlu1 %652 }
 0x2f5   :  { %657 = vst.msk [vmem:[#allocation5 + $0x8] sm:$0xff] %vm51_vm1, %v653_v25 }
 0x2f6   :  { %923 = shalt.err (!%p920_p6)
}
 0x2f7   :  { %s924_s7 = scalar_lea.hbm %s1144_s6, 256 }
 0x2f8   :  { %p925_p7 = scmp.ne.s32.totalorder %s1144_s6, %s924_s7  ;;  %p928_p8 = scmp.lt.u32.totalorder %s924_s7, %s1144_s6 }
 0x2fa   :  { %p930_p9 = pnand %p928_p8, %p925_p7 }
 0x2fc   :  { %933 = shalt.err (!%p930_p9)
}
 0x2fd   :  { %669 = dma.vmem_to_hbm [thread:$0]  %s664_s14, 256, %s1144_s6, [#allocation4], %s941_s11, %s941_s11, %s942_s12  }
 0x2fe   :  { %936 = dma.done.wait [#allocation4], 256  }
 0x2ff   :  { %937 = vsyncadd [#allocation4], 4294967040 }
 0x300   :  { %938 = dma.done.wait [#allocation7], 256  }
 0x301   :  { %939 = vsyncadd [#allocation7], 4294967040 }
 0x302   :  { %688 = vsyncpa [#allocation3], 1 }
 0x303   :  { %689 = vsyncpa [#allocation4], 1 }
 0x304   :  { %690 = vsyncpa [#allocation7], 1 }

</bundles_post_ra>
